<compile_context>
chip_gen: v7x
topology: tpu7x:2x2x1
jax: 0.10.0
libtpu: 0.0.40
codegen_flags: <defaults>
</compile_context>

<pallas_src>
import functools

import jax
import jax.numpy as jnp
from jax import lax
from jax.experimental import pallas as pl
from jax.experimental.pallas import tpu as pltpu


# Plain Python floats only: jnp scalars at module scope would be captured as
# closure constants inside the kernel, which pallas_call rejects.
_NEG_BIG = -1.0e30     # mask for padded doc columns (never wins the row max)
_F32_MIN = -3.0e38     # init for the running row max (finite, below any real score)


def _round_up(x, m):
    return (x + m - 1) // m * m


def _vmem_capacity_bytes():
    try:
        cap = int(pltpu.get_tpu_info().vmem_capacity_bytes)
    except Exception:
        cap = 0
    if cap <= 0:
        cap = 64 * 1024 * 1024      # v7x-safe default if the query fails
    return cap


def _stable_softplus(x):
    return jnp.maximum(x, 0.0) + jnp.log1p(jnp.exp(-jnp.abs(x)))


# ----------------------------------------------------------------------------
# Primary path: doc_embeddings resident in VMEM, 1-D grid over query-row tiles.
# ----------------------------------------------------------------------------
def _bipairwise_resident_kernel(q_ref, d_ref, out_ref, *, tile_m, batch, b_pad):
    i = pl.program_id(0)                                        # query-row tile

    # scores[r, c] = <q_r, d_c>: contract last dims (NT form, no transpose),
    # f32 accumulation on the MXU.
    scores = lax.dot_general(
        q_ref[...], d_ref[...],
        dimension_numbers=(((1,), (1,)), ((), ())),
        preferred_element_type=jnp.float32)                     # (tile_m, b_pad)

    # Narrow iotas + broadcast compare instead of two full (tile_m, b_pad) iotas.
    row_g = lax.broadcasted_iota(jnp.int32, (tile_m, 1), 0) + i * tile_m
    col_g = lax.broadcasted_iota(jnp.int32, (1, b_pad), 1)
    is_diag = row_g == col_g

    # Positives come straight from the scores row (scores[b, b]).
    pos = jnp.sum(jnp.where(is_diag, scores, 0.0), axis=1, keepdims=True)

    # Diagonal exclusion exactly as the reference (subtract 1e6 on the diagonal),
    # then mask padded doc columns (static no-op when the batch is tile-aligned).
    neg_scores = jnp.where(is_diag, scores - 1e6, scores)
    if b_pad > batch:
        neg_scores = jnp.where(col_g >= batch, _NEG_BIG, neg_scores)
    neg = jnp.max(neg_scores, axis=1, keepdims=True)

    sp = _stable_softplus(neg - pos)
    if b_pad > batch:
        sp = jnp.where(row_g < batch, sp, 0.0)                  # padded query rows
    out_ref[...] = sp


# ----------------------------------------------------------------------------
# Fallback path: 2-D tiled kernel (huge B*D where d cannot stay resident).
# ----------------------------------------------------------------------------
def _bipairwise_tiled_kernel(q_ref, d_ref, out_ref, pos_ref, neg_ref, *,
                             tile_m, tile_n, ratio, batch, b_pad, num_col_tiles):
    i = pl.program_id(0)     # query-row tile (parallel)
    j = pl.program_id(1)     # doc-column tile (reduction axis, last)

    @pl.when(j == 0)
    def _init():
        pos_ref[...] = jnp.zeros((tile_m, 1), jnp.float32)
        neg_ref[...] = jnp.full((tile_m, 1), _F32_MIN, jnp.float32)

    scores = lax.dot_general(
        q_ref[...], d_ref[...],
        dimension_numbers=(((1,), (1,)), ((), ())),
        preferred_element_type=jnp.float32)                     # (tile_m, tile_n)

    has_pad = b_pad > batch                                     # static python bool
    diag_overlap = (j // ratio) == i                            # tile_m % tile_n == 0
    last_col = j == num_col_tiles - 1
    not_diag = jnp.logical_not(diag_overlap)

    # Diagonal-carrying blocks only (ratio out of num_col_tiles steps per row tile):
    # extract positives from the already-computed scores and apply the diagonal
    # exclusion before the running max.
    @pl.when(diag_overlap)
    def _diag_block():
        row_g = lax.broadcasted_iota(jnp.int32, (tile_m, 1), 0) + i * tile_m
        col_g = lax.broadcasted_iota(jnp.int32, (1, tile_n), 1) + j * tile_n
        is_diag = row_g == col_g
        pos_ref[...] += jnp.sum(jnp.where(is_diag, scores, 0.0), axis=1,
                                keepdims=True)
        s = jnp.where(is_diag, scores - 1e6, scores)
        if has_pad:
            s = jnp.where(col_g >= batch, _NEG_BIG, s)
        neg_ref[...] = jnp.maximum(neg_ref[...],
                                   jnp.max(s, axis=1, keepdims=True))

    if has_pad:
        # Padded columns only exist in the last column tile: gate the mask there.
        @pl.when(not_diag & last_col)
        def _offdiag_last():
            col_g = lax.broadcasted_iota(jnp.int32, (1, tile_n), 1) + j * tile_n
            s = jnp.where(col_g >= batch, _NEG_BIG, scores)
            neg_ref[...] = jnp.maximum(neg_ref[...],
                                       jnp.max(s, axis=1, keepdims=True))

        @pl.when(not_diag & jnp.logical_not(last_col))
        def _offdiag():
            neg_ref[...] = jnp.maximum(neg_ref[...],
                                       jnp.max(scores, axis=1, keepdims=True))
    else:
        @pl.when(not_diag)
        def _offdiag():
            neg_ref[...] = jnp.maximum(neg_ref[...],
                                       jnp.max(scores, axis=1, keepdims=True))

    @pl.when(last_col)
    def _finalize():
        sp = _stable_softplus(neg_ref[...] - pos_ref[...])
        if has_pad:
            row_g = lax.broadcasted_iota(jnp.int32, (tile_m, 1), 0) + i * tile_m
            sp = jnp.where(row_g < batch, sp, 0.0)
        out_ref[...] = sp


# ----------------------------------------------------------------------------
# Tile planning.
# ----------------------------------------------------------------------------
def _resident_plan(batch, dim, itemsize, budget_bytes):
    """Pick tile_m for the doc-resident path, or None if d cannot stay in VMEM."""
    candidates = []
    for t in (1024, 512, 256, 128, 64, 32, 16, 8):
        if t > _round_up(batch, 8):
            continue
        b_pad = _round_up(batch, t)
        need = (2 * b_pad * dim * itemsize      # resident d (conservatively 2 bufs)
                + 2 * t * dim * itemsize        # double-buffered q row tile
                + 3 * t * b_pad * 4             # scores + select temporaries (f32)
                + 4 * t * 4)                    # pos/neg/softplus/out columns
        if need <= budget_bytes:
            candidates.append(t)
    if not candidates:
        return None
    # Prefer >= 2 row tiles so the "parallel" axis can feed both v7x TensorCores.
    multi = [t for t in candidates if _round_up(batch, t) // t >= 2]
    tile_m = multi[0] if multi else candidates[0]
    return tile_m, _round_up(batch, tile_m)


def _tiled_plan(batch, dim, itemsize, budget_bytes, tile_m=None, tile_n=None):
    """2-D fallback tiles: tile_m grown (>= tile_n) for d-reuse."""
    if tile_m is None or tile_n is None:
        if batch >= 1024:
            tile_m, tile_n = 1024, 256
        elif batch >= 512:
            tile_m, tile_n = 512, 256
        elif batch >= 256:
            tile_m, tile_n = 256, 256
        else:
            tile_m = tile_n = _round_up(batch, 8)

        def _need(tm):
            return (2 * tm * dim * itemsize + 2 * tile_n * dim * itemsize
                    + 3 * tm * tile_n * 4 + 4 * tm * 4)

        while tile_m > tile_n and _need(tile_m) > budget_bytes:
            tile_m //= 2
    assert tile_m % tile_n == 0, (tile_m, tile_n)
    return tile_m, tile_n, _round_up(batch, tile_m)


# ----------------------------------------------------------------------------
# Public wrapper.
# ----------------------------------------------------------------------------
def bi_pairwise_ce_loss(query_embeddings, doc_embeddings, *,
                        cast_to_bf16=False,
                        _force_tiled=False, _tile_m=None, _tile_n=None):
    """query_embeddings: (B, D), doc_embeddings: (B, D) -> scalar f32 loss."""
    B, D = query_embeddings.shape
    assert doc_embeddings.shape == (B, D)

    if cast_to_bf16:
        # Halves HBM/VMEM traffic and avoids the slow f32 MXU path on v5e;
        # matmul accumulation stays f32 (preferred_element_type in the kernels).
        query_embeddings = query_embeddings.astype(jnp.bfloat16)
        doc_embeddings = doc_embeddings.astype(jnp.bfloat16)

    itemsize = jnp.dtype(query_embeddings.dtype).itemsize
    vmem_cap = _vmem_capacity_bytes()                     # 64 MiB v7x, 128 MiB v5e/v6e
    budget = max(int(vmem_cap * 3 // 4), 32 * 1024 * 1024)

    plan = None if _force_tiled else _resident_plan(B, D, itemsize, budget)

    if plan is not None:
        tile_m, b_pad = plan
        if b_pad != B:
            pad = ((0, b_pad - B), (0, 0))
            query_embeddings = jnp.pad(query_embeddings, pad)
            doc_embeddings = jnp.pad(doc_embeddings, pad)
        nt = b_pad // tile_m
        kernel = functools.partial(_bipairwise_resident_kernel,
                                   tile_m=tile_m, batch=B, b_pad=b_pad)
        per_row = pl.pallas_call(
            kernel,
            out_shape=jax.ShapeDtypeStruct((b_pad, 1), jnp.float32),
            grid_spec=pltpu.PrefetchScalarGridSpec(
                num_scalar_prefetch=0,
                grid=(nt,),
                in_specs=[
                    pl.BlockSpec((tile_m, D), lambda i: (i, 0)),   # query row tile
                    pl.BlockSpec((b_pad, D), lambda i: (0, 0)),    # resident docs
                ],
                out_specs=pl.BlockSpec((tile_m, 1), lambda i: (i, 0)),
            ),
            compiler_params=pltpu.CompilerParams(
                dimension_semantics=("parallel",),
                vmem_limit_bytes=budget,
            ),
            cost_estimate=pl.CostEstimate(
                flops=2 * b_pad * b_pad * D,
                transcendentals=2 * b_pad,
                bytes_accessed=2 * b_pad * D * itemsize + 4 * b_pad),
        )(query_embeddings, doc_embeddings)
    else:
        tile_m, tile_n, b_pad = _tiled_plan(B, D, itemsize, budget,
                                            _tile_m, _tile_n)
        if b_pad != B:
            pad = ((0, b_pad - B), (0, 0))
            query_embeddings = jnp.pad(query_embeddings, pad)
            doc_embeddings = jnp.pad(doc_embeddings, pad)
        nt_rows, nt_cols = b_pad // tile_m, b_pad // tile_n
        kernel = functools.partial(
            _bipairwise_tiled_kernel, tile_m=tile_m, tile_n=tile_n,
            ratio=tile_m // tile_n, batch=B, b_pad=b_pad, num_col_tiles=nt_cols)
        per_row = pl.pallas_call(
            kernel,
            out_shape=jax.ShapeDtypeStruct((b_pad, 1), jnp.float32),
            grid_spec=pltpu.PrefetchScalarGridSpec(
                num_scalar_prefetch=0,
                grid=(nt_rows, nt_cols),
                in_specs=[
                    pl.BlockSpec((tile_m, D), lambda i, j: (i, 0)),   # query rows
                    pl.BlockSpec((tile_n, D), lambda i, j: (j, 0)),   # doc columns
                ],
                out_specs=pl.BlockSpec((tile_m, 1), lambda i, j: (i, 0)),
                scratch_shapes=[
                    pltpu.VMEM((tile_m, 1), jnp.float32),   # pos accumulator
                    pltpu.VMEM((tile_m, 1), jnp.float32),   # running row max
                ],
            ),
            compiler_params=pltpu.CompilerParams(
                dimension_semantics=("parallel", "arbitrary"),
                vmem_limit_bytes=budget,
            ),
            cost_estimate=pl.CostEstimate(
                flops=2 * b_pad * b_pad * D,
                transcendentals=2 * b_pad,
                bytes_accessed=(1 + nt_rows) * b_pad * D * itemsize + 4 * b_pad),
        )(query_embeddings, doc_embeddings)

    # TODO(synk): forward pass only; wrap in jax.custom_vjp before training use.
    return jnp.sum(per_row) / B


def _reference_loss(q, d):
    """Pure-JAX mirror of the PyTorch module."""
    scores = jnp.einsum("bd,cd->bc", q, d,
                        precision=lax.Precision.HIGHEST).astype(jnp.float32)
    pos = jnp.diagonal(scores)
    neg = jnp.max(scores - jnp.eye(scores.shape[0], dtype=scores.dtype) * 1e6, axis=1)
    return jnp.mean(jax.nn.softplus(neg - pos))


if __name__ == "__main__":
    key = jax.random.PRNGKey(0)

    def _check(loss, ref, tag, atol=1e-3, rtol=1e-3):
        loss = jax.block_until_ready(loss)
        ref = jax.block_until_ready(ref)
        assert jnp.allclose(loss, ref, atol=atol, rtol=rtol), (tag, loss, ref)

    # Case 1: tiny aligned batch (single-block resident path).
    k0, k1, key = jax.random.split(key, 3)
    q1 = jax.random.normal(k0, (8, 32), dtype=jnp.float32)
    d1 = jax.random.normal(k1, (8, 32), dtype=jnp.float32)
    _check(bi_pairwise_ce_loss(q1, d1), _reference_loss(q1, d1), "small")

    # Case 2: non-tile-aligned batch -> resident path with 2 row tiles + padding masks.
    k0, k1, key = jax.random.split(key, 3)
    q2 = jax.random.normal(k0, (200, 64), dtype=jnp.float32)
    d2 = jax.random.normal(k1, (200, 64), dtype=jnp.float32)
    _check(bi_pairwise_ce_loss(q2, d2), _reference_loss(q2, d2), "resident")

    # Case 3: bf16 fast path (compare against the reference on bf16-rounded inputs).
    k0, k1, key = jax.random.split(key, 3)
    q3 = jax.random.normal(k0, (64, 128), dtype=jnp.float32)
    d3 = jax.random.normal(k1, (64, 128), dtype=jnp.float32)
    q3r = q3.astype(jnp.bfloat16).astype(jnp.float32)
    d3r = d3.astype(jnp.bfloat16).astype(jnp.float32)
    _check(bi_pairwise_ce_loss(q3, d3, cast_to_bf16=True),
           _reference_loss(q3r, d3r), "bf16", atol=5e-3, rtol=5e-3)

    # Case 4: force the 2-D tiled fallback (tile_m > tile_n, padding, diag gating).
    _check(bi_pairwise_ce_loss(q2, d2, _force_tiled=True, _tile_m=64, _tile_n=32),
           _reference_loss(q2, d2), "tiled")

    print("KERNEL_OK")
</pallas_src>

<mosaic_0001>
module attributes {stable_mosaic.version = 11 : i64} {
  func.func @_bipairwise_resident_kernel(%arg0: i32, %arg1: memref<8x32xf32, #tpu.memory_space<vmem>>, %arg2: memref<8x32xf32, #tpu.memory_space<vmem>>, %arg3: memref<8x1xf32, #tpu.memory_space<vmem>>) attributes {dimension_semantics = [#tpu.dimension_semantics<parallel>], iteration_bounds = array<i64: 1>, scalar_prefetch = 0 : i64, scratch_operands = 0 : i64, tpu.core_type = #tpu.core_type<tc>, window_params = [{transform_indices = @transform_0, window_bounds = array<i64: 8, 32>}, {pipeline_mode = #tpu.pipeline_mode<synchronous>, transform_indices = @transform_1, window_bounds = array<i64: 8, 32>}, {transform_indices = @transform_2, window_bounds = array<i64: 8, 1>}]} {
    %c0 = arith.constant 0 : index
    %c0_0 = arith.constant 0 : index
    %0 = vector.load %arg1[%c0, %c0_0] : memref<8x32xf32, #tpu.memory_space<vmem>>, vector<8x32xf32>
    %c0_1 = arith.constant 0 : index
    %c0_2 = arith.constant 0 : index
    %1 = vector.load %arg2[%c0_1, %c0_2] : memref<8x32xf32, #tpu.memory_space<vmem>>, vector<8x32xf32>
    %cst = arith.constant dense<0.000000e+00> : vector<8x8xf32>
    %2 = tpu.matmul %0, %1, %cst {dimension_numbers = #tpu.dot_dimension_numbers<[1], [1], [0], [0], [0, 0, 1, 0], [], []>} : vector<8x32xf32>, vector<8x32xf32>, vector<8x8xf32> -> vector<8x8xf32>
    %3 = tpu.iota {dimensions = array<i32: 0>} : vector<8x1xi32>
    %c8_i32 = arith.constant 8 : i32
    %4 = arith.muli %arg0, %c8_i32 : i32
    %5 = vector.broadcast %4 : i32 to vector<8x1xi32>
    %6 = arith.addi %3, %5 : vector<8x1xi32>
    %7 = tpu.iota {dimensions = array<i32: 1>} : vector<1x8xi32>
    %8 = vector.broadcast %6 : vector<8x1xi32> to vector<8x8xi32>
    %9 = vector.broadcast %7 : vector<1x8xi32> to vector<8x8xi32>
    %10 = arith.cmpi eq, %8, %9 : vector<8x8xi32>
    %cst_3 = arith.constant 0.000000e+00 : f32
    %11 = vector.broadcast %cst_3 : f32 to vector<8x8xf32>
    %12 = arith.select %10, %2, %11 : vector<8x8xi1>, vector<8x8xf32>
    %cst_4 = arith.constant dense<0.000000e+00> : vector<8xf32>
    %13 = vector.multi_reduction <add>, %12, %cst_4 [1] : vector<8x8xf32> to vector<8xf32>
    %14 = vector.shape_cast %13 : vector<8xf32> to vector<8x1xf32>
    %cst_5 = arith.constant 1.000000e+06 : f32
    %15 = vector.broadcast %cst_5 : f32 to vector<8x8xf32>
    %16 = arith.subf %2, %15 : vector<8x8xf32>
    %17 = arith.select %10, %16, %2 : vector<8x8xi1>, vector<8x8xf32>
    %cst_6 = arith.constant dense<0xFF800000> : vector<8xf32>
    %18 = vector.multi_reduction <maximumf>, %17, %cst_6 [1] : vector<8x8xf32> to vector<8xf32>
    %19 = vector.shape_cast %18 : vector<8xf32> to vector<8x1xf32>
    %20 = arith.subf %19, %14 : vector<8x1xf32>
    %cst_7 = arith.constant 0.000000e+00 : f32
    %21 = vector.broadcast %cst_7 : f32 to vector<8x1xf32>
    %22 = arith.maximumf %20, %21 : vector<8x1xf32>
    %23 = math.absf %20 : vector<8x1xf32>
    %cst_8 = arith.constant 0.000000e+00 : f32
    %24 = vector.broadcast %cst_8 : f32 to vector<8x1xf32>
    %25 = arith.subf %24, %23 : vector<8x1xf32>
    %26 = math.exp %25 : vector<8x1xf32>
    %27 = math.log1p %26 : vector<8x1xf32>
    %28 = arith.addf %22, %27 : vector<8x1xf32>
    %c0_9 = arith.constant 0 : index
    %c0_10 = arith.constant 0 : index
    %29 = vector.load %arg3[%c0_9, %c0_10] : memref<8x1xf32, #tpu.memory_space<vmem>>, vector<8x1xf32>
    tpu.vector_store %arg3[%c0_9, %c0_10], %28 {strides = array<i32>} : memref<8x1xf32, #tpu.memory_space<vmem>>, vector<8x1xf32>,
    return
  }
  func.func @transform_0(%arg0: i32) -> (i32, i32) {
    %c0_i32 = arith.constant 0 : i32
    %c0_i32_0 = arith.constant 0 : i32
    return %arg0, %c0_i32 : i32, i32
  }
  func.func @transform_1(%arg0: i32) -> (i32, i32) {
    %c0_i32 = arith.constant 0 : i32
    %c0_i32_0 = arith.constant 0 : i32
    %c0_i32_1 = arith.constant 0 : i32
    return %c0_i32, %c0_i32_0 : i32, i32
  }
  func.func @transform_2(%arg0: i32) -> (i32, i32) {
    %c0_i32 = arith.constant 0 : i32
    %c0_i32_0 = arith.constant 0 : i32
    return %arg0, %c0_i32 : i32, i32
  }
}

</mosaic_0001>

<bundles_post_ra>
// kernel: tpu_custom_call.1
= control target key start
LH: loop header
LB: loop body
LE: loop exit
PB: predicated region body
PF: predicated region fallthrough
CT: control target
= control target key end

     0   :  { %7 = vsyncpa [#allocation3], 0  ;;  %s268_s0 = inlined_call_operand.hbm [shape: f32[8,32], index: 0, kind: input, shape index: {}]   ;;  %s269_s1 = inlined_call_operand.hbm [shape: f32[8,32], index: 1, kind: input, shape index: {}]   ;;  %s270_s2 = inlined_call_operand.vmem [shape: f32[8,1], index: 2, kind: output, shape index: {}]  }
   0x1   :  { %8 = vsyncpa [#allocation5], 0  ;;  %s222_s9 = smov [#allocation2]   ;;  %s223_s11 = smov [#allocation4]  }
   0x2   :  { %s15_s10 = sshll.u32 %s222_s9, 4  ;;  %s25_s12 = sshll.u32 %s223_s11, 4  ;;  %s16_s10 = int_to_ptr.vmem [resolvable:$true] %s15_s10  ;;  %s26_s12 = int_to_ptr.vmem [resolvable:$true] %s25_s12 }
   0x3   :  { %s174_s15 = scalar_lea.hbm %s268_s0, 128 }
   0x4   :  { %p175_p0 = scmp.ne.s32.totalorder %s268_s0, %s174_s15  ;;  %p178_p1 = scmp.lt.u32.totalorder %s174_s15, %s268_s0 }
   0x6   :  { %p180_p2 = pnand %p178_p1, %p175_p0 }
   0x8   :  { %183 = shalt.err (!%p180_p2)
}
   0x9   :  { %s184_s20 = scalar_lea.vmem %s16_s10, 128  ;;  %p189_p4 = scmp.lt.s32.totalorder %s16_s10, %s16_s10 }
   0xa   :  { %p185_p3 = scmp.ne.s32.totalorder %s16_s10, %s184_s20  ;;  %p190_p5 = scmp.lt.s32.totalorder %s184_s20, %s184_s20 }
   0xc   :  { %p191_p6 = por %p190_p5, %p189_p4 }
   0xe   :  { %p192_p7 = pnand %p191_p6, %p185_p3 }
  0x10   :  { %195 = shalt.err (!%p192_p7)
}
  0x11   :  { %18 = dma.hbm_to_vmem [thread:$0]  %s268_s0, 128, %s16_s10, [#allocation3]  }
  0x12   :  { %s196_s25 = scalar_lea.hbm %s269_s1, 128 }
  0x13   :  { %p197_p8 = scmp.ne.s32.totalorder %s269_s1, %s196_s25  ;;  %p200_p9 = scmp.lt.u32.totalorder %s196_s25, %s269_s1 }
  0x15   :  { %p202_p10 = pnand %p200_p9, %p197_p8 }
  0x17   :  { %205 = shalt.err (!%p202_p10)
}
  0x18   :  { %s206_s30 = scalar_lea.vmem %s26_s12, 128  ;;  %p211_p12 = scmp.lt.s32.totalorder %s26_s12, %s26_s12 }
  0x19   :  { %p207_p11 = scmp.ne.s32.totalorder %s26_s12, %s206_s30  ;;  %p212_p13 = scmp.lt.s32.totalorder %s206_s30, %s206_s30 }
  0x1b   :  { %p213_p0 = por %p212_p13, %p211_p12 }
  0x1d   :  { %p214_p1 = pnand %p213_p0, %p207_p11 }
  0x1f   :  { %217 = shalt.err (!%p214_p1)
}
  0x20   :  { %28 = dma.hbm_to_vmem [thread:$0]  %s269_s1, 128, %s26_s12, [#allocation5]  }
  0x21   :  { %218 = dma.done.wait [#allocation3], 128  }
  0x22   :  { %219 = vsyncadd [#allocation3], 4294967168 }
  0x23   :  { %220 = dma.done.wait [#allocation5], 128  }
  0x24   :  { %221 = vsyncadd [#allocation5], 4294967168  ;;  %v224_v0 = vmov 0.0   ;;  %vm225_vm0 = vmmov 0   ;;  %vm37_vm1 = vcmask 261120   ;;  %v36_v1 = vld [vmem:[#allocation4] sm:$0xff]  ;;  %v114_v3 = vlaneseq }
  0x25   :  { %161 = vmatprep.subr.mxu0 %v224_v0  ;;  %163 = vmatprep.mubr.msk.f32.mxu0 %vm225_vm0, %v224_v0  ;;  %v35_v2 = vld [vmem:[#allocation2] sm:$0xff]  ;;  %vm123_vm3 = vcmask 64512   ;;  %vm148_vm5 = vcmask 7168  }
  0x26   :  { %162 = vmatpush3.xpose.msk.msra.mxu0 %vm37_vm1, %v36_v1  ;;  %v115_v4 = vshrl.u32 %v114_v3, 7  ;;  %v120_v5 = vand.u32 127, %v114_v3 }
  0x28   :  { %vm121_vm2 = vcmp.eq.s32.totalorder %v115_v4, %v120_v5 }
  0x29   :  { %164 = vmatmul.mubr.msk.f32.vlgmr.msra.gmra.mrb[0].mxu0 %vm37_vm1, %v35_v2 }
  0xfc   :  { %v110_v6 = vpop.f32.mrb[0].mxu0 }
  0xfd   :  { %v158_v7 = vadd.f32 -1000000.0, %v110_v6  ;;  %v165_v8 = vpop.f32.mrb[1].mxu0  ;;  %v122_v9 = vsel %vm121_vm2, %v110_v6, 0.0 }
  0xfe   :  { %v124_v10 = vsel %vm123_vm3, %v122_v9, 0.0 }
  0xff   :  { %125 = vadd.xlane.f32.xlu0 %v124_v10  ;;  %v128_v11 = vsel %vm121_vm2, %v158_v7, %v110_v6 }
 0x100   :  { %v129_v12 = vsel %vm123_vm3, %v128_v11, -inf }
 0x103   :  { %130 = vmax.xlane.f32.xlu0 %v129_v12 }
 0x18c   :  { %v126_v13 = vpop.xlane.xlu0 %125 }
 0x190   :  { %v131_v14 = vpop.xlane.xlu0 %130 }
 0x191   :  { %v132_v15 = vsub.f32 %v131_v14, %v126_v13 }
 0x193   :  { %v134_v16 = vand.u32 2147483647, %v132_v15  ;;  %v133_v27 = vmax.f32 %v132_v15, 0.0 }
 0x195   :  { %v135_v17 = vsub.f32 0.0, %v134_v16 }
 0x197   :  { %v136_v18 = vmul.f32 1.442695, %v135_v17 }
 0x199   :  { %170 = vpow2.f32 %v136_v18 }
 0x1a3   :  { %v171_v19 = vpop.eup %170 }
 0x1a4   :  { %v138_v20 = vadd.f32 1.0, %v171_v19  ;;  %v141_v21 = vmul.f32 -0.5, %v171_v19  ;;  %v144_v23 = vand.u32 2147483647, %v171_v19 }
 0x1a6   :  { %172 = vlog2.f32 %v138_v20  ;;  %v142_v22 = vadd.f32 1.0, %v141_v21  ;;  %vm145_vm4 = vcmp.lt.f32.partialorder %v144_v23, 0.0004427343 }
 0x1a8   :  { %v143_v26 = vmul.f32 %v171_v19, %v142_v22 }
 0x1b0   :  { %v173_v24 = vpop.eup %172 }
 0x1b1   :  { %v140_v25 = vmul.f32 0.6931472, %v173_v24 }
 0x1b3   :  { %v146_v28 = vsel %vm145_vm4, %v143_v26, %v140_v25 }
 0x1b4   :  { %v147_v29 = vadd.f32 %v146_v28, %v133_v27 }
 0x1b6   :  { %149 = vst.msk [vmem:[%s270_s2] sm:$0xff] %vm148_vm5, %v147_v29 }
 0x1b7   :  { %154 = vsyncpa [#allocation3], 1 }
 0x1b8   :  { %155 = vsyncpa [#allocation5], 1 }

</bundles_post_ra>
